<compile_context>
chip_gen: v7x
topology: tpu7x:2x2x1
jax: 0.10.0
libtpu: 0.0.40
codegen_flags: <defaults>
</compile_context>

<pallas_src>
import functools
import math

import jax
import jax.numpy as jnp
from jax.experimental import pallas as pl
from jax.experimental.pallas import tpu as pltpu

LANE = 128
SUBLANE = 8


def _sublane_granularity(dtype) -> int:
    """Packed sublane granularity: 8 for 32-bit, 16 for 16-bit, 32 for 8-bit."""
    itemsize = jnp.dtype(dtype).itemsize
    return SUBLANE * max(1, 4 // max(1, itemsize))


def _detect_num_cores() -> int:
    """2 TensorCores per chip on v7x (and v4/v5p megacore), 1 on v5e/v6e."""
    try:
        kind = jax.devices()[0].device_kind.lower()
    except Exception:
        return 1
    if any(tag in kind for tag in ("v7", "v5p", "v4")):
        return 2
    return 1


def _l1_sum_kernel(p_ref, l_ref, o_ref, *, nb, nbpc, tr, rows, chunk):
    """Accumulate sum(|pred - label|) of this (tr, 128) tile into a resident
    per-core (8, 128) f32 partial.  Tiles stream in their native dtype; math is
    done in f32 on small row-chunks so VMEM intermediates stay ~1 MiB."""
    c = pl.program_id(0)          # parallel (per-TensorCore) axis
    i = pl.program_id(1)          # sequential reduction axis over row-blocks

    @pl.when(i == 0)
    def _init():
        o_ref[...] = jnp.zeros_like(o_ref)

    b = c * nbpc + i              # logical row-block id (may overshoot on trailing core)
    row0 = b * tr                 # first row of this block in the (rows, 128) slab

    # Static chunk schedule covering [0, tr); every offset/size is a multiple of
    # the packed sublane granularity.
    chunks = []
    off = 0
    while off < tr:
        sz = min(chunk, tr - off)
        chunks.append((off, sz))
        off += sz

    def tile_sum(mask_rows):
        acc = jnp.zeros((SUBLANE, LANE), jnp.float32)
        for coff, csz in chunks:
            p = p_ref[pl.ds(coff, csz), :].astype(jnp.float32)
            l = l_ref[pl.ds(coff, csz), :].astype(jnp.float32)
            a = jnp.abs(p - l)
            if mask_rows:
                # Only the single partial edge block takes this path.  Rows past
                # the end of the slab hold arbitrary (possibly NaN) data from
                # the clamped DMA -> discard with a select, never a multiply.
                rid = row0 + coff + jax.lax.broadcasted_iota(jnp.int32, a.shape, 0)
                a = jnp.where(rid < rows, a, 0.0)
            # Pairwise vreg adds down to one (8, 128) tile; the cross-sublane /
            # cross-lane reduce happens once, in the wrapper.
            acc = acc + jnp.sum(a.reshape(-1, SUBLANE, LANE), axis=0)
        return acc

    is_real = b < nb                                      # surplus clamped blocks add 0
    is_full = jnp.logical_and(is_real, row0 + tr <= rows)
    is_edge = jnp.logical_and(is_real, row0 + tr > rows)

    @pl.when(is_full)                                     # fast path: sub + abs + add
    def _full():
        o_ref[...] += tile_sum(False)

    @pl.when(is_edge)                                     # runs at most once per core
    def _edge():
        o_ref[...] += tile_sum(True)


def molecules_criterion(pred, label, *,
                        target_block_bytes=4 * 1024 * 1024,
                        chunk_rows=1024,
                        num_cores=None,
                        small_n_fallback=1 << 16):
    """Mean absolute error (nn.L1Loss default 'mean'), Pallas TPU kernel path for
    large 128-aligned inputs, fused XLA reduce otherwise."""
    assert pred.shape == label.shape, "pred/label must have identical shapes"
    n = int(math.prod(pred.shape)) if pred.shape else 1

    def xla_path():
        d = pred.astype(jnp.float32) - label.astype(jnp.float32)
        return jnp.mean(jnp.abs(d))

    ncores = int(num_cores) if num_cores is not None else _detect_num_cores()
    ncores = max(1, min(2, ncores))

    gran = max(_sublane_granularity(pred.dtype), _sublane_granularity(label.dtype))
    itemsize = max(jnp.dtype(pred.dtype).itemsize, jnp.dtype(label.dtype).itemsize)

    rows = n // LANE
    # Kernel path needs a zero-copy bitcast to a (rows, 128) lane-dense slab
    # (n % 128 == 0) and enough rows for every core slice to get a real block.
    # TODO(synk): lane-misaligned totals go through the fused XLA reduce (still
    # HBM-roofline); a copy-free kernel path for them would need 1-D tiling.
    if (n % LANE != 0) or (rows < ncores * gran) or (n < small_n_fallback):
        return xla_path()

    # Tile size by BYTES (~4 MiB of each input per grid step): big enough to
    # amortize the ~0.35 us/step fixed cost to ~90% of HBM roofline, small
    # enough that 2 inputs x 2 pipeline buffers stays well inside 32 MiB VMEM.
    tr = max(1, target_block_bytes // (LANE * itemsize))
    tr = min(tr, rows // ncores)              # guarantee nb >= ncores
    tr = max(gran, (tr // gran) * gran)

    nb = pl.cdiv(rows, tr)                    # row-blocks (last one may be partial)
    nbpc = pl.cdiv(nb, ncores)                # row-blocks per core
    chunk = max(gran, (min(chunk_rows, tr) // gran) * gran)

    p2 = pred.reshape(rows, LANE)             # pure bitcast: no pad, no copy
    l2 = label.reshape(rows, LANE)

    def in_map(c, i):
        # Clamp so the trailing core's surplus steps never DMA past the slab;
        # the kernel skips their accumulation (b >= nb).
        return (jnp.minimum(c * nbpc + i, nb - 1), 0)

    kernel = functools.partial(_l1_sum_kernel, nb=nb, nbpc=nbpc, tr=tr,
                               rows=rows, chunk=chunk)

    partials = pl.pallas_call(
        kernel,
        out_shape=jax.ShapeDtypeStruct((ncores * SUBLANE, LANE), jnp.float32),
        grid_spec=pltpu.PrefetchScalarGridSpec(
            num_scalar_prefetch=0,
            grid=(ncores, nbpc),
            in_specs=[
                pl.BlockSpec((tr, LANE), in_map),
                pl.BlockSpec((tr, LANE), in_map),
            ],
            # Per-core resident (8, 128) accumulator block (lane-dense output).
            out_specs=pl.BlockSpec((SUBLANE, LANE), lambda c, i: (c, 0)),
        ),
        compiler_params=pltpu.CompilerParams(
            dimension_semantics=("parallel", "arbitrary"),
            vmem_limit_bytes=32 * 1024 * 1024,
        ),
    )(p2, l2)

    # Single cheap cross-sublane/lane/core reduce + mean normalization.
    # TODO(synk): for N >~ 1e9 elements consider Kahan / per-block partial
    # outputs if bit-tight agreement with torch is required.
    return jnp.sum(partials) * jnp.float32(1.0 / n)


if __name__ == "__main__":
    key = jax.random.PRNGKey(0)
    k1, k2 = jax.random.split(key)

    def ref_l1(a, b):
        return jnp.mean(jnp.abs(a.astype(jnp.float32) - b.astype(jnp.float32)))

    # 1) tiny graph-regression head (8, 1): fused-XLA fallback path.
    p = jax.random.normal(k1, (8, 1), dtype=jnp.float32)
    l = jax.random.normal(k2, (8, 1), dtype=jnp.float32)
    out = jax.block_until_ready(molecules_criterion(p, l))
    assert jnp.allclose(out, ref_l1(p, l), rtol=1e-6, atol=1e-6), (out, ref_l1(p, l))

    # 2) small lane-aligned 4-D tensor -> Pallas kernel (force past size cutoff).
    p = jax.random.normal(k1, (2, 4, 16, 16), dtype=jnp.float32)
    l = jax.random.normal(k2, (2, 4, 16, 16), dtype=jnp.float32)
    out = jax.block_until_ready(molecules_criterion(p, l, small_n_fallback=0))
    assert jnp.allclose(out, ref_l1(p, l), rtol=1e-5, atol=1e-6), (out, ref_l1(p, l))

    # 3) deliberately tiny tiles: exercises the gated masked edge block
    #    (168 % 16 = 8 valid rows) and, with 2 cores, the clamped surplus step.
    p = jax.random.normal(k1, (168, 128), dtype=jnp.float32)
    l = jax.random.normal(k2, (168, 128), dtype=jnp.float32)
    out = jax.block_until_ready(
        molecules_criterion(p, l, small_n_fallback=0,
                            target_block_bytes=16 * LANE * 4))
    assert jnp.allclose(out, ref_l1(p, l), rtol=1e-5, atol=1e-6), (out, ref_l1(p, l))

    # 4) bf16 inputs streamed in native dtype, f32 math inside the kernel.
    p = jax.random.normal(k1, (16, 8, 128), dtype=jnp.float32).astype(jnp.bfloat16)
    l = jax.random.normal(k2, (16, 8, 128), dtype=jnp.float32).astype(jnp.bfloat16)
    out = jax.block_until_ready(molecules_criterion(p, l, small_n_fallback=0))
    assert jnp.allclose(out, ref_l1(p, l), rtol=1e-5, atol=1e-5), (out, ref_l1(p, l))

    # 5) lane-misaligned total: fused XLA reduce path (no pad / no copy).
    p = jax.random.normal(k1, (150, 129), dtype=jnp.float32)
    l = jax.random.normal(k2, (150, 129), dtype=jnp.float32)
    out = jax.block_until_ready(molecules_criterion(p, l))
    assert jnp.allclose(out, ref_l1(p, l), rtol=1e-5, atol=1e-6), (out, ref_l1(p, l))

    # 6) default config on a mid-sized aligned tensor: byte-sized tiles, kernel path.
    p = jax.random.normal(k1, (8, 8, 32, 128), dtype=jnp.float32)
    l = jax.random.normal(k2, (8, 8, 32, 128), dtype=jnp.float32)
    out = jax.block_until_ready(molecules_criterion(p, l))
    assert jnp.allclose(out, ref_l1(p, l), rtol=1e-5, atol=1e-6), (out, ref_l1(p, l))

    print("KERNEL_OK")
</pallas_src>

<mosaic_0001>
module attributes {stable_mosaic.version = 11 : i64} {
  func.func @_l1_sum_kernel(%arg0: i32, %arg1: i32, %arg2: memref<16x128xf32, #tpu.memory_space<vmem>>, %arg3: memref<16x128xf32, #tpu.memory_space<vmem>>, %arg4: memref<8x128xf32, #tpu.memory_space<vmem>>) attributes {dimension_semantics = [#tpu.dimension_semantics<parallel>, #tpu.dimension_semantics<arbitrary>], iteration_bounds = array<i64: 1, 1>, scalar_prefetch = 0 : i64, scratch_operands = 0 : i64, tpu.core_type = #tpu.core_type<tc>, window_params = [{transform_indices = @transform_0, window_bounds = array<i64: 16, 128>}, {transform_indices = @transform_1, window_bounds = array<i64: 16, 128>}, {transform_indices = @transform_2, window_bounds = array<i64: 8, 128>}]} {
    %c0_i32 = arith.constant 0 : i32
    %0 = arith.cmpi eq, %arg1, %c0_i32 : i32
    %1 = arith.extui %0 : i1 to i32
    %c0_i32_0 = arith.constant 0 : i32
    %2 = arith.cmpi ne, %1, %c0_i32_0 : i32
    scf.if %2 {
      %cst = arith.constant 0.000000e+00 : f32
      %17 = vector.broadcast %cst : f32 to vector<8x128xf32>
      %c0 = arith.constant 0 : index
      %c0_8 = arith.constant 0 : index
      %18 = vector.load %arg4[%c0, %c0_8] : memref<8x128xf32, #tpu.memory_space<vmem>>, vector<8x128xf32>
      tpu.vector_store %arg4[%c0, %c0_8], %17 {strides = array<i32>} : memref<8x128xf32, #tpu.memory_space<vmem>>, vector<8x128xf32>,
    } else {
    }
    %c1_i32 = arith.constant 1 : i32
    %3 = arith.muli %arg0, %c1_i32 : i32
    %4 = arith.addi %3, %arg1 : i32
    %c16_i32 = arith.constant 16 : i32
    %5 = arith.muli %4, %c16_i32 : i32
    %c1_i32_1 = arith.constant 1 : i32
    %6 = arith.cmpi slt, %4, %c1_i32_1 : i32
    %c16_i32_2 = arith.constant 16 : i32
    %7 = arith.addi %5, %c16_i32_2 : i32
    %c16_i32_3 = arith.constant 16 : i32
    %8 = arith.cmpi sle, %7, %c16_i32_3 : i32
    %9 = arith.andi %6, %8 : i1
    %c16_i32_4 = arith.constant 16 : i32
    %10 = arith.addi %5, %c16_i32_4 : i32
    %c16_i32_5 = arith.constant 16 : i32
    %11 = arith.cmpi sgt, %10, %c16_i32_5 : i32
    %12 = arith.andi %6, %11 : i1
    %13 = arith.extui %9 : i1 to i32
    %c0_i32_6 = arith.constant 0 : i32
    %14 = arith.cmpi ne, %13, %c0_i32_6 : i32
    scf.if %14 {
      %c0 = arith.constant 0 : index
      %c0_8 = arith.constant 0 : index
      %17 = vector.load %arg4[%c0, %c0_8] : memref<8x128xf32, #tpu.memory_space<vmem>>, vector<8x128xf32>
      %cst = arith.constant 0.000000e+00 : f32
      %18 = vector.broadcast %cst : f32 to vector<8x128xf32>
      %c0_9 = arith.constant 0 : index
      %c0_10 = arith.constant 0 : index
      %19 = vector.load %arg2[%c0_9, %c0_10] : memref<16x128xf32, #tpu.memory_space<vmem>>, vector<16x128xf32>
      %c0_11 = arith.constant 0 : index
      %c0_12 = arith.constant 0 : index
      %20 = vector.load %arg3[%c0_11, %c0_12] : memref<16x128xf32, #tpu.memory_space<vmem>>, vector<16x128xf32>
      %21 = arith.subf %19, %20 : vector<16x128xf32>
      %22 = math.absf %21 : vector<16x128xf32>
      %23 = vector.shape_cast %22 : vector<16x128xf32> to vector<2x8x128xf32>
      %cst_13 = arith.constant dense<0.000000e+00> : vector<8x128xf32>
      %24 = vector.multi_reduction <add>, %23, %cst_13 [0] : vector<2x8x128xf32> to vector<8x128xf32>
      %25 = arith.addf %18, %24 : vector<8x128xf32>
      %26 = arith.addf %17, %25 : vector<8x128xf32>
      %c0_14 = arith.constant 0 : index
      %c0_15 = arith.constant 0 : index
      %27 = vector.load %arg4[%c0_14, %c0_15] : memref<8x128xf32, #tpu.memory_space<vmem>>, vector<8x128xf32>
      tpu.vector_store %arg4[%c0_14, %c0_15], %26 {strides = array<i32>} : memref<8x128xf32, #tpu.memory_space<vmem>>, vector<8x128xf32>,
    } else {
    }
    %15 = arith.extui %12 : i1 to i32
    %c0_i32_7 = arith.constant 0 : i32
    %16 = arith.cmpi ne, %15, %c0_i32_7 : i32
    scf.if %16 {
      %c0 = arith.constant 0 : index
      %c0_8 = arith.constant 0 : index
      %17 = vector.load %arg4[%c0, %c0_8] : memref<8x128xf32, #tpu.memory_space<vmem>>, vector<8x128xf32>
      %cst = arith.constant 0.000000e+00 : f32
      %18 = vector.broadcast %cst : f32 to vector<8x128xf32>
      %c0_9 = arith.constant 0 : index
      %c0_10 = arith.constant 0 : index
      %19 = vector.load %arg2[%c0_9, %c0_10] : memref<16x128xf32, #tpu.memory_space<vmem>>, vector<16x128xf32>
      %c0_11 = arith.constant 0 : index
      %c0_12 = arith.constant 0 : index
      %20 = vector.load %arg3[%c0_11, %c0_12] : memref<16x128xf32, #tpu.memory_space<vmem>>, vector<16x128xf32>
      %21 = arith.subf %19, %20 : vector<16x128xf32>
      %22 = math.absf %21 : vector<16x128xf32>
      %c0_i32_13 = arith.constant 0 : i32
      %23 = arith.addi %5, %c0_i32_13 : i32
      %24 = tpu.iota {dimensions = array<i32: 0>} : vector<16x128xi32>
      %25 = vector.broadcast %23 : i32 to vector<16x128xi32>
      %26 = arith.addi %25, %24 : vector<16x128xi32>
      %c16_i32_14 = arith.constant 16 : i32
      %27 = vector.broadcast %c16_i32_14 : i32 to vector<16x128xi32>
      %28 = arith.cmpi slt, %26, %27 : vector<16x128xi32>
      %cst_15 = arith.constant 0.000000e+00 : f32
      %29 = vector.broadcast %cst_15 : f32 to vector<16x128xf32>
      %30 = arith.select %28, %22, %29 : vector<16x128xi1>, vector<16x128xf32>
      %31 = vector.shape_cast %30 : vector<16x128xf32> to vector<2x8x128xf32>
      %cst_16 = arith.constant dense<0.000000e+00> : vector<8x128xf32>
      %32 = vector.multi_reduction <add>, %31, %cst_16 [0] : vector<2x8x128xf32> to vector<8x128xf32>
      %33 = arith.addf %18, %32 : vector<8x128xf32>
      %34 = arith.addf %17, %33 : vector<8x128xf32>
      %c0_17 = arith.constant 0 : index
      %c0_18 = arith.constant 0 : index
      %35 = vector.load %arg4[%c0_17, %c0_18] : memref<8x128xf32, #tpu.memory_space<vmem>>, vector<8x128xf32>
      tpu.vector_store %arg4[%c0_17, %c0_18], %34 {strides = array<i32>} : memref<8x128xf32, #tpu.memory_space<vmem>>, vector<8x128xf32>,
    } else {
    }
    return
  }
  func.func @transform_0(%arg0: i32, %arg1: i32) -> (i32, i32) {
    %c1_i32 = arith.constant 1 : i32
    %0 = arith.muli %arg0, %c1_i32 : i32
    %1 = arith.addi %0, %arg1 : i32
    %c0_i32 = arith.constant 0 : i32
    %2 = arith.minsi %1, %c0_i32 : i32
    %c0_i32_0 = arith.constant 0 : i32
    %c0_i32_1 = arith.constant 0 : i32
    return %2, %c0_i32_0 : i32, i32
  }
  func.func @transform_1(%arg0: i32, %arg1: i32) -> (i32, i32) {
    %c1_i32 = arith.constant 1 : i32
    %0 = arith.muli %arg0, %c1_i32 : i32
    %1 = arith.addi %0, %arg1 : i32
    %c0_i32 = arith.constant 0 : i32
    %2 = arith.minsi %1, %c0_i32 : i32
    %c0_i32_0 = arith.constant 0 : i32
    %c0_i32_1 = arith.constant 0 : i32
    return %2, %c0_i32_0 : i32, i32
  }
  func.func @transform_2(%arg0: i32, %arg1: i32) -> (i32, i32) {
    %c0_i32 = arith.constant 0 : i32
    %c0_i32_0 = arith.constant 0 : i32
    return %arg0, %c0_i32 : i32, i32
  }
}

</mosaic_0001>

<bundles_post_ra>
// kernel: tpu_custom_call.1
= control target key start
LH: loop header
LB: loop body
LE: loop exit
PB: predicated region body
PF: predicated region fallthrough
CT: control target
= control target key end

     0   :  { %7 = vsyncpa [#allocation3], 0  ;;  %s269_s0 = inlined_call_operand.hbm [shape: f32[16,128], index: 0, kind: input, shape index: {}]   ;;  %s270_s1 = inlined_call_operand.hbm [shape: f32[16,128], index: 1, kind: input, shape index: {}]   ;;  %s271_s2 = inlined_call_operand.hbm [shape: f32[8,128], index: 2, kind: output, shape index: {}]  }
   0x1   :  { %8 = vsyncpa [#allocation6], 0 }
   0x2   :  { %9 = vsyncpa [#allocation4], 0  ;;  %s213_s9 = smov [#allocation2]   ;;  %s141_s13 = scalar_lea.hbm %s269_s0, 256 }
   0x3   :  { %s21_s10 = sshll.u32 %s213_s9, 4  ;;  %p142_p0 = scmp.ne.s32.totalorder %s269_s0, %s141_s13  ;;  %s22_s10 = int_to_ptr.vmem [resolvable:$true] %s21_s10 }
   0x4   :  { %p145_p1 = scmp.lt.u32.totalorder %s141_s13, %s269_s0 }
   0x6   :  { %p147_p2 = pnand %p145_p1, %p142_p0 }
   0x8   :  { %150 = shalt.err (!%p147_p2)
}
   0x9   :  { %s151_s18 = scalar_lea.vmem %s22_s10, 256  ;;  %p156_p4 = scmp.lt.s32.totalorder %s22_s10, %s22_s10 }
   0xa   :  { %p152_p3 = scmp.ne.s32.totalorder %s22_s10, %s151_s18  ;;  %p157_p5 = scmp.lt.s32.totalorder %s151_s18, %s151_s18 }
   0xc   :  { %p158_p6 = por %p157_p5, %p156_p4 }
   0xe   :  { %p159_p7 = pnand %p158_p6, %p152_p3 }
  0x10   :  { %162 = shalt.err (!%p159_p7)
}
  0x11   :  { %s214_s19 = smov 128   ;;  %s215_s20 = smov 8  }
  0x12   :  { %27 = dma.hbm_to_vmem [thread:$0]  %s269_s0, 256, %s22_s10, [#allocation3], %s214_s19, %s214_s19, %s215_s20  }
  0x13   :  { %s216_s23 = smov [#allocation5]   ;;  %s163_s27 = scalar_lea.hbm %s270_s1, 256 }
  0x14   :  { %s39_s24 = sshll.u32 %s216_s23, 4  ;;  %p164_p8 = scmp.ne.s32.totalorder %s270_s1, %s163_s27  ;;  %s40_s24 = int_to_ptr.vmem [resolvable:$true] %s39_s24 }
  0x15   :  { %p167_p9 = scmp.lt.u32.totalorder %s163_s27, %s270_s1 }
  0x17   :  { %p169_p10 = pnand %p167_p9, %p164_p8 }
  0x19   :  { %172 = shalt.err (!%p169_p10)
}
  0x1a   :  { %s173_s4 = scalar_lea.vmem %s40_s24, 256  ;;  %p178_p12 = scmp.lt.s32.totalorder %s40_s24, %s40_s24 }
  0x1b   :  { %p174_p11 = scmp.ne.s32.totalorder %s40_s24, %s173_s4  ;;  %p179_p13 = scmp.lt.s32.totalorder %s173_s4, %s173_s4 }
  0x1d   :  { %p180_p0 = por %p179_p13, %p178_p12 }
  0x1f   :  { %p181_p1 = pnand %p180_p0, %p174_p11 }
  0x21   :  { %184 = shalt.err (!%p181_p1)
}
  0x22   :  { %45 = dma.hbm_to_vmem [thread:$0]  %s270_s1, 256, %s40_s24, [#allocation6], %s214_s19, %s214_s19, %s215_s20  }
  0x23   :  { %207 = dma.done.wait [#allocation3], 256  }
  0x24   :  { %208 = vsyncadd [#allocation3], 4294967040 }
  0x25   :  { %209 = dma.done.wait [#allocation6], 256  }
  0x26   :  { %210 = vsyncadd [#allocation6], 4294967040  ;;  %v78_v0 = vld [vmem:[#allocation2] sm:$0xff]  ;;  %v79_v1 = vld [vmem:[#allocation2 + $0x8] sm:$0xff]  ;;  %s217_s6 = smov [#allocation7]  }
  0x27   :  { %v80_v2 = vld [vmem:[#allocation5] sm:$0xff]  ;;  %v81_v3 = vld [vmem:[#allocation5 + $0x8] sm:$0xff]  ;;  %s121_s7 = sshll.u32 %s217_s6, 4  ;;  %s122_s7 = int_to_ptr.vmem [resolvable:$true] %s121_s7 }
  0x28   :  { %v82_v4 = vsub.f32 %v78_v0, %v80_v2  ;;  %v83_v5 = vsub.f32 %v79_v1, %v81_v3  ;;  %s185_s8 = scalar_lea.vmem %s122_s7, 128  ;;  %p190_p3 = scmp.lt.s32.totalorder %s122_s7, %s122_s7 }
  0x29   :  { %p186_p2 = scmp.ne.s32.totalorder %s122_s7, %s185_s8  ;;  %p191_p4 = scmp.lt.s32.totalorder %s185_s8, %s185_s8 }
  0x2a   :  { %v84_v6 = vand.u32 2147483647, %v82_v4  ;;  %v85_v7 = vand.u32 2147483647, %v83_v5 }
  0x2b   :  { %p192_p5 = por %p191_p4, %p190_p3 }
  0x2c   :  { %v86_v8 = vadd.f32 %v85_v7, %v84_v6 }
  0x2d   :  { %p193_p6 = pnand %p192_p5, %p186_p2 }
  0x2e   :  { %89 = vst [vmem:[#allocation7] sm:$0xff] %v86_v8 }
  0x2f   :  { %196 = shalt.err (!%p193_p6)
}
  0x30   :  { %s197_s10 = scalar_lea.hbm %s271_s2, 128 }
  0x31   :  { %p198_p7 = scmp.ne.s32.totalorder %s271_s2, %s197_s10  ;;  %p201_p8 = scmp.lt.u32.totalorder %s197_s10, %s271_s2 }
  0x33   :  { %p203_p9 = pnand %p201_p8, %p198_p7 }
  0x35   :  { %206 = shalt.err (!%p203_p9)
}
  0x36   :  { %124 = dma.vmem_to_hbm [thread:$0]  %s122_s7, 128, %s271_s2, [#allocation4]  }
  0x37   :  { %211 = dma.done.wait [#allocation4], 128  }
  0x38   :  { %212 = vsyncadd [#allocation4], 4294967168 }
  0x39   :  { %128 = vsyncpa [#allocation3], 1 }
  0x3a   :  { %129 = vsyncpa [#allocation6], 1 }
  0x3b   :  { %130 = vsyncpa [#allocation4], 1 }

</bundles_post_ra>
